<compile_context>
chip_gen: v7x
topology: tpu7x:2x2x1
jax: 0.10.0
libtpu: 0.0.40
codegen_flags: <defaults>
</compile_context>

<pallas_src>
import jax
import jax.numpy as jnp
from jax.experimental import pallas as pl
from jax.experimental.pallas import tpu as pltpu

_NEG_BIG = -1e30  # finite "-inf" for masked logits (avoids inf-inf NaNs)


def _make_kernel(s_actual: int, s_tile: int):
    def kernel(l_ref, g_ref, w_ref, c_ref, gout_ref, m_sc, d_sc, acc_sc):
        # l_ref, g_ref : (1, C, TS) VMEM   inputs (channels on sublanes)
        # w_ref        : (C, 1)     VMEM   1x1-conv weight (out_channels = 1)
        # c_ref        : (1, 1, TS) VMEM   pre-softmax logits for this S tile
        # gout_ref     : (1, 1, C)  VMEM   attention-pooled features
        # m_sc, d_sc   : (1, 1)     VMEM   online-softmax running max / denom
        # acc_sc       : (1, C)     VMEM   running un-normalized pooled feats
        s_idx = pl.program_id(1)

        @pl.when(s_idx == 0)
        def _():
            m_sc[...] = jnp.full_like(m_sc, _NEG_BIG)
            d_sc[...] = jnp.zeros_like(d_sc)
            acc_sc[...] = jnp.zeros_like(acc_sc)

        l = l_ref[0].astype(jnp.float32)          # (C, TS)
        x = l + g_ref[0].astype(jnp.float32)      # (C, TS)
        w = w_ref[...].astype(jnp.float32)        # (C, 1)

        # 1x1 conv, no bias: lane-broadcast w over S, reduce over the small
        # sublane C axis -> exact f32 logits, no cross-lane XLU reduce.
        logits = jnp.sum(x * w, axis=0, keepdims=True)          # (1, TS)
        c_ref[...] = logits[None, :, :].astype(c_ref.dtype)     # lane-dense

        # Online softmax across S tiles; mask out spatial padding lanes.
        pos = jax.lax.broadcasted_iota(jnp.int32, logits.shape, 1) + s_idx * s_tile
        masked = jnp.where(pos < s_actual, logits, jnp.float32(_NEG_BIG))

        m_prev = m_sc[...]                                          # (1, 1)
        m_new = jnp.maximum(m_prev, jnp.max(masked, axis=-1, keepdims=True))
        alpha = jnp.exp(m_prev - m_new)                             # (1, 1)
        p = jnp.exp(masked - m_new)                                 # (1, TS)
        d_sc[...] = alpha * d_sc[...] + jnp.sum(p, axis=-1, keepdims=True)

        # Attention-weighted spatial sum on the MXU:
        #   contract (1, TS) . (C, TS) over TS -> (1, C)
        part = jax.lax.dot_general(
            p, l, (((1,), (1,)), ((), ())),
            preferred_element_type=jnp.float32)
        acc_sc[...] = alpha * acc_sc[...] + part
        m_sc[...] = m_new

        @pl.when(s_idx == pl.num_programs(1) - 1)
        def _():
            gout = acc_sc[...] * pl.reciprocal(d_sc[...], approx=False)
            gout_ref[...] = gout[None, :, :].astype(gout_ref.dtype)

    return kernel


def linear_attention_block(l_nchw, g_nchw, weight, *, s_tile=None):
    """l_nchw, g_nchw: (N, C, W, H); weight: (1, C, 1, 1).

    Returns (c, g_out) with c: (N, 1, W, H) f32, g_out: (N, C) f32,
    matching the PyTorch module with normalize_attn=True.
    """
    N, C, W, H = l_nchw.shape
    S = W * H

    # (N, C, S) is a pure reshape of NCHW -> no transpose / extra HBM pass.
    l_ncs = l_nchw.reshape(N, C, S)
    g_ncs = g_nchw.reshape(N, C, S)
    w_col = weight.reshape(C, 1)          # sublane-aligned conv weight

    # Spatial tile: lane-dense (multiple of 128) and small enough that the
    # double-buffered pair of (C, s_tile) inputs stays far under scoped-VMEM
    # defaults on every chip (v5e 16 MiB, v6e 32 MiB, v7x 32/64 MiB).
    s_full = ((S + 127) // 128) * 128
    if s_tile is None:
        bytes_per = jnp.dtype(l_nchw.dtype).itemsize
        budget = 8 * 1024 * 1024
        s_tile = 128
        for cand in (4096, 2048, 1024, 512, 256, 128):
            if 2 * 2 * C * cand * bytes_per <= budget:
                s_tile = cand
                break
    s_tile = max(128, min(int(s_tile), s_full))
    assert s_tile % 128 == 0, "s_tile must be a multiple of 128"

    S_pad = ((S + s_tile - 1) // s_tile) * s_tile
    if S_pad != S:
        pad = ((0, 0), (0, 0), (0, S_pad - S))
        l_ncs = jnp.pad(l_ncs, pad)
        g_ncs = jnp.pad(g_ncs, pad)
    n_s = S_pad // s_tile

    kernel = _make_kernel(S, s_tile)

    grid_spec = pltpu.PrefetchScalarGridSpec(
        num_scalar_prefetch=0,
        grid=(N, n_s),  # batch (parallel) first, S-reduction (arbitrary) last
        in_specs=[
            pl.BlockSpec((1, C, s_tile), lambda n, s: (n, 0, s)),
            pl.BlockSpec((1, C, s_tile), lambda n, s: (n, 0, s)),
            pl.BlockSpec((C, 1), lambda n, s: (0, 0)),  # constant block
        ],
        out_specs=[
            pl.BlockSpec((1, 1, s_tile), lambda n, s: (n, 0, s)),  # lane-dense c
            pl.BlockSpec((1, 1, C), lambda n, s: (n, 0, 0)),       # resident over S
        ],
        scratch_shapes=[
            pltpu.VMEM((1, 1), jnp.float32),  # running max
            pltpu.VMEM((1, 1), jnp.float32),  # running denom
            pltpu.VMEM((1, C), jnp.float32),  # running un-normalized g_out
        ],
    )

    c_out, gout = pl.pallas_call(
        kernel,
        out_shape=(
            jax.ShapeDtypeStruct((N, 1, S_pad), jnp.float32),
            jax.ShapeDtypeStruct((N, 1, C), jnp.float32),
        ),
        grid_spec=grid_spec,
        compiler_params=pltpu.CompilerParams(
            dimension_semantics=("parallel", "arbitrary")),
    )(l_ncs, g_ncs, w_col)

    c_nchw = c_out[:, :, :S].reshape(N, 1, W, H)
    g_vec = gout.reshape(N, C)
    return c_nchw, g_vec


def _reference(l, g, weight):
    # Pure-JAX reference mirroring the PyTorch forward (normalize_attn=True),
    # written with elementwise ops + sums so it stays exact f32.
    N, C, W, H = l.shape
    x = l + g
    c = (x * weight.reshape(1, C, 1, 1)).sum(axis=1, keepdims=True)  # (N,1,W,H)
    a = jax.nn.softmax(c.reshape(N, 1, -1), axis=2).reshape(N, 1, W, H)
    gout = (a * l).reshape(N, C, -1).sum(axis=2)
    return c, gout


def _check(l, g, w, **kw):
    c_k, g_k = linear_attention_block(l, g, w, **kw)
    jax.block_until_ready((c_k, g_k))
    c_r, g_r = _reference(l, g, w)
    assert c_k.shape == c_r.shape and g_k.shape == g_r.shape
    # Conv logits path is exact f32 -> tight tolerance.
    assert jnp.allclose(c_k, c_r, atol=1e-5, rtol=1e-5), \
        float(jnp.max(jnp.abs(c_k - c_r)))
    # g_out goes through an MXU f32 contraction whose pass count (and hence
    # rounding) is chip/compiler dependent; 1e-2 still catches any structural
    # or online-softmax bug (those show up as >>1e-1 errors).
    assert jnp.allclose(g_k, g_r, atol=1e-2, rtol=1e-2), \
        float(jnp.max(jnp.abs(g_k - g_r)))


if __name__ == "__main__":
    key = jax.random.PRNGKey(0)
    k1, k2, k3, k4, k5, k6 = jax.random.split(key, 6)

    # Case 1: lane-aligned spatial (S = 256), single S tile.
    N, C, W, H = 2, 4, 16, 16
    l = jax.random.normal(k1, (N, C, W, H), dtype=jnp.float32)
    g = jax.random.normal(k2, (N, C, W, H), dtype=jnp.float32)
    w = jax.random.normal(k3, (1, C, 1, 1), dtype=jnp.float32) * 0.5
    _check(l, g, w)

    # Case 2: same inputs, forced small S tile -> exercises the multi-tile
    # online-softmax accumulation path.
    _check(l, g, w, s_tile=128)

    # Case 3: non-multiple-of-128 spatial (S = 49) -> exercises pad + mask.
    N2, C2, W2, H2 = 2, 3, 7, 7
    l2 = jax.random.normal(k4, (N2, C2, W2, H2), dtype=jnp.float32)
    g2 = jax.random.normal(k5, (N2, C2, W2, H2), dtype=jnp.float32)
    w2 = jax.random.normal(k6, (1, C2, 1, 1), dtype=jnp.float32) * 0.5
    _check(l2, g2, w2)

    print("KERNEL_OK")
</pallas_src>

<mosaic_0001>
module attributes {stable_mosaic.version = 11 : i64} {
  func.func @kernel(%arg0: i32, %arg1: i32, %arg2: memref<1x4x256xf32, #tpu.memory_space<vmem>>, %arg3: memref<1x4x256xf32, #tpu.memory_space<vmem>>, %arg4: memref<4x1xf32, #tpu.memory_space<vmem>>, %arg5: memref<1x1x256xf32, #tpu.memory_space<vmem>>, %arg6: memref<1x1x4xf32, #tpu.memory_space<vmem>>, %arg7: memref<1x1xf32, #tpu.memory_space<vmem>>, %arg8: memref<1x1xf32, #tpu.memory_space<vmem>>, %arg9: memref<1x4xf32, #tpu.memory_space<vmem>>) attributes {dimension_semantics = [#tpu.dimension_semantics<parallel>, #tpu.dimension_semantics<arbitrary>], iteration_bounds = array<i64: 2, 1>, scalar_prefetch = 0 : i64, scratch_operands = 3 : i64, tpu.core_type = #tpu.core_type<tc>, window_params = [{transform_indices = @transform_0, window_bounds = array<i64: 1, 4, 256>}, {transform_indices = @transform_1, window_bounds = array<i64: 1, 4, 256>}, {pipeline_mode = #tpu.pipeline_mode<synchronous>, transform_indices = @transform_2, window_bounds = array<i64: 4, 1>}, {transform_indices = @transform_3, window_bounds = array<i64: 1, 1, 256>}, {transform_indices = @transform_4, window_bounds = array<i64: 1, 1, 4>}]} {
    %c0_i32 = arith.constant 0 : i32
    %0 = arith.cmpi eq, %arg1, %c0_i32 : i32
    %1 = arith.extui %0 : i1 to i32
    %c0_i32_0 = arith.constant 0 : i32
    %2 = arith.cmpi ne, %1, %c0_i32_0 : i32
    scf.if %2 {
      %cst_30 = arith.constant -1.000000e+30 : f32
      %48 = vector.broadcast %cst_30 : f32 to vector<1x1xf32>
      %c0_31 = arith.constant 0 : index
      %c0_32 = arith.constant 0 : index
      %49 = vector.load %arg7[%c0_31, %c0_32] : memref<1x1xf32, #tpu.memory_space<vmem>>, vector<1x1xf32>
      tpu.vector_store %arg7[%c0_31, %c0_32], %48 {strides = array<i32>} : memref<1x1xf32, #tpu.memory_space<vmem>>, vector<1x1xf32>,
      %cst_33 = arith.constant 0.000000e+00 : f32
      %50 = vector.broadcast %cst_33 : f32 to vector<1x1xf32>
      %c0_34 = arith.constant 0 : index
      %c0_35 = arith.constant 0 : index
      %51 = vector.load %arg8[%c0_34, %c0_35] : memref<1x1xf32, #tpu.memory_space<vmem>>, vector<1x1xf32>
      tpu.vector_store %arg8[%c0_34, %c0_35], %50 {strides = array<i32>} : memref<1x1xf32, #tpu.memory_space<vmem>>, vector<1x1xf32>,
      %cst_36 = arith.constant 0.000000e+00 : f32
      %52 = vector.broadcast %cst_36 : f32 to vector<1x4xf32>
      %c0_37 = arith.constant 0 : index
      %c0_38 = arith.constant 0 : index
      %53 = vector.load %arg9[%c0_37, %c0_38] : memref<1x4xf32, #tpu.memory_space<vmem>>, vector<1x4xf32>
      tpu.vector_store %arg9[%c0_37, %c0_38], %52 {strides = array<i32>} : memref<1x4xf32, #tpu.memory_space<vmem>>, vector<1x4xf32>,
    } else {
    }
    %c0 = arith.constant 0 : index
    %c0_1 = arith.constant 0 : index
    %c0_2 = arith.constant 0 : index
    %3 = vector.load %arg2[%c0, %c0_1, %c0_2] : memref<1x4x256xf32, #tpu.memory_space<vmem>>, vector<1x4x256xf32>
    %4 = vector.shape_cast %3 : vector<1x4x256xf32> to vector<4x256xf32>
    %c0_3 = arith.constant 0 : index
    %c0_4 = arith.constant 0 : index
    %c0_5 = arith.constant 0 : index
    %5 = vector.load %arg3[%c0_3, %c0_4, %c0_5] : memref<1x4x256xf32, #tpu.memory_space<vmem>>, vector<1x4x256xf32>
    %6 = vector.shape_cast %5 : vector<1x4x256xf32> to vector<4x256xf32>
    %7 = arith.addf %4, %6 : vector<4x256xf32>
    %c0_6 = arith.constant 0 : index
    %c0_7 = arith.constant 0 : index
    %8 = vector.load %arg4[%c0_6, %c0_7] : memref<4x1xf32, #tpu.memory_space<vmem>>, vector<4x1xf32>
    %9 = vector.broadcast %8 : vector<4x1xf32> to vector<4x256xf32>
    %10 = arith.mulf %7, %9 : vector<4x256xf32>
    %cst = arith.constant dense<0.000000e+00> : vector<256xf32>
    %11 = vector.multi_reduction <add>, %10, %cst [0] : vector<4x256xf32> to vector<256xf32>
    %12 = vector.shape_cast %11 : vector<256xf32> to vector<1x256xf32>
    %13 = vector.shape_cast %12 : vector<1x256xf32> to vector<1x1x256xf32>
    %c0_8 = arith.constant 0 : index
    %c0_9 = arith.constant 0 : index
    %c0_10 = arith.constant 0 : index
    %14 = vector.load %arg5[%c0_8, %c0_9, %c0_10] : memref<1x1x256xf32, #tpu.memory_space<vmem>>, vector<1x1x256xf32>
    tpu.vector_store %arg5[%c0_8, %c0_9, %c0_10], %13 {strides = array<i32>} : memref<1x1x256xf32, #tpu.memory_space<vmem>>, vector<1x1x256xf32>,
    %15 = tpu.iota {dimensions = array<i32: 1>} : vector<1x256xi32>
    %c256_i32 = arith.constant 256 : i32
    %16 = arith.muli %arg1, %c256_i32 : i32
    %17 = vector.broadcast %16 : i32 to vector<1x256xi32>
    %18 = arith.addi %15, %17 : vector<1x256xi32>
    %c256_i32_11 = arith.constant 256 : i32
    %19 = vector.broadcast %c256_i32_11 : i32 to vector<1x256xi32>
    %20 = arith.cmpi slt, %18, %19 : vector<1x256xi32>
    %cst_12 = arith.constant -1.000000e+30 : f32
    %21 = vector.broadcast %cst_12 : f32 to vector<1x256xf32>
    %22 = arith.select %20, %12, %21 : vector<1x256xi1>, vector<1x256xf32>
    %c0_13 = arith.constant 0 : index
    %c0_14 = arith.constant 0 : index
    %23 = vector.load %arg7[%c0_13, %c0_14] : memref<1x1xf32, #tpu.memory_space<vmem>>, vector<1x1xf32>
    %cst_15 = arith.constant dense<0xFF800000> : vector<1xf32>
    %24 = vector.multi_reduction <maximumf>, %22, %cst_15 [1] : vector<1x256xf32> to vector<1xf32>
    %25 = vector.shape_cast %24 : vector<1xf32> to vector<1x1xf32>
    %26 = arith.maximumf %23, %25 : vector<1x1xf32>
    %27 = arith.subf %23, %26 : vector<1x1xf32>
    %28 = math.exp %27 : vector<1x1xf32>
    %29 = vector.broadcast %26 : vector<1x1xf32> to vector<1x256xf32>
    %30 = arith.subf %22, %29 : vector<1x256xf32>
    %31 = math.exp %30 : vector<1x256xf32>
    %c0_16 = arith.constant 0 : index
    %c0_17 = arith.constant 0 : index
    %32 = vector.load %arg8[%c0_16, %c0_17] : memref<1x1xf32, #tpu.memory_space<vmem>>, vector<1x1xf32>
    %33 = arith.mulf %28, %32 : vector<1x1xf32>
    %cst_18 = arith.constant dense<0.000000e+00> : vector<1xf32>
    %34 = vector.multi_reduction <add>, %31, %cst_18 [1] : vector<1x256xf32> to vector<1xf32>
    %35 = vector.shape_cast %34 : vector<1xf32> to vector<1x1xf32>
    %36 = arith.addf %33, %35 : vector<1x1xf32>
    %c0_19 = arith.constant 0 : index
    %c0_20 = arith.constant 0 : index
    %37 = vector.load %arg8[%c0_19, %c0_20] : memref<1x1xf32, #tpu.memory_space<vmem>>, vector<1x1xf32>
    tpu.vector_store %arg8[%c0_19, %c0_20], %36 {strides = array<i32>} : memref<1x1xf32, #tpu.memory_space<vmem>>, vector<1x1xf32>,
    %cst_21 = arith.constant dense<0.000000e+00> : vector<1x4xf32>
    %38 = tpu.matmul %31, %4, %cst_21 {dimension_numbers = #tpu.dot_dimension_numbers<[1], [1], [0], [0], [0, 0, 1, 0], [], []>} : vector<1x256xf32>, vector<4x256xf32>, vector<1x4xf32> -> vector<1x4xf32>
    %c0_22 = arith.constant 0 : index
    %c0_23 = arith.constant 0 : index
    %39 = vector.load %arg9[%c0_22, %c0_23] : memref<1x4xf32, #tpu.memory_space<vmem>>, vector<1x4xf32>
    %40 = vector.broadcast %28 : vector<1x1xf32> to vector<1x4xf32>
    %41 = arith.mulf %40, %39 : vector<1x4xf32>
    %42 = arith.addf %41, %38 : vector<1x4xf32>
    %c0_24 = arith.constant 0 : index
    %c0_25 = arith.constant 0 : index
    %43 = vector.load %arg9[%c0_24, %c0_25] : memref<1x4xf32, #tpu.memory_space<vmem>>, vector<1x4xf32>
    tpu.vector_store %arg9[%c0_24, %c0_25], %42 {strides = array<i32>} : memref<1x4xf32, #tpu.memory_space<vmem>>, vector<1x4xf32>,
    %c0_26 = arith.constant 0 : index
    %c0_27 = arith.constant 0 : index
    %44 = vector.load %arg7[%c0_26, %c0_27] : memref<1x1xf32, #tpu.memory_space<vmem>>, vector<1x1xf32>
    tpu.vector_store %arg7[%c0_26, %c0_27], %26 {strides = array<i32>} : memref<1x1xf32, #tpu.memory_space<vmem>>, vector<1x1xf32>,
    %c0_i32_28 = arith.constant 0 : i32
    %45 = arith.cmpi eq, %arg1, %c0_i32_28 : i32
    %46 = arith.extui %45 : i1 to i32
    %c0_i32_29 = arith.constant 0 : i32
    %47 = arith.cmpi ne, %46, %c0_i32_29 : i32
    scf.if %47 {
      %c0_30 = arith.constant 0 : index
      %c0_31 = arith.constant 0 : index
      %48 = vector.load %arg9[%c0_30, %c0_31] : memref<1x4xf32, #tpu.memory_space<vmem>>, vector<1x4xf32>
      %c0_32 = arith.constant 0 : index
      %c0_33 = arith.constant 0 : index
      %49 = vector.load %arg8[%c0_32, %c0_33] : memref<1x1xf32, #tpu.memory_space<vmem>>, vector<1x1xf32>
      %50 = tpu.reciprocal %49 : vector<1x1xf32> -> vector<1x1xf32>
      %51 = vector.broadcast %50 : vector<1x1xf32> to vector<1x4xf32>
      %52 = arith.mulf %48, %51 : vector<1x4xf32>
      %53 = vector.shape_cast %52 : vector<1x4xf32> to vector<1x1x4xf32>
      %c0_34 = arith.constant 0 : index
      %c0_35 = arith.constant 0 : index
      %c0_36 = arith.constant 0 : index
      %54 = vector.load %arg6[%c0_34, %c0_35, %c0_36] : memref<1x1x4xf32, #tpu.memory_space<vmem>>, vector<1x1x4xf32>
      tpu.vector_store %arg6[%c0_34, %c0_35, %c0_36], %53 {strides = array<i32>} : memref<1x1x4xf32, #tpu.memory_space<vmem>>, vector<1x1x4xf32>,
    } else {
    }
    return
  }
  func.func @transform_0(%arg0: i32, %arg1: i32) -> (i32, i32, i32) {
    %c0_i32 = arith.constant 0 : i32
    %c0_i32_0 = arith.constant 0 : i32
    return %arg0, %c0_i32, %arg1 : i32, i32, i32
  }
  func.func @transform_1(%arg0: i32, %arg1: i32) -> (i32, i32, i32) {
    %c0_i32 = arith.constant 0 : i32
    %c0_i32_0 = arith.constant 0 : i32
    return %arg0, %c0_i32, %arg1 : i32, i32, i32
  }
  func.func @transform_2(%arg0: i32, %arg1: i32) -> (i32, i32) {
    %c0_i32 = arith.constant 0 : i32
    %c0_i32_0 = arith.constant 0 : i32
    %c0_i32_1 = arith.constant 0 : i32
    return %c0_i32, %c0_i32_0 : i32, i32
  }
  func.func @transform_3(%arg0: i32, %arg1: i32) -> (i32, i32, i32) {
    %c0_i32 = arith.constant 0 : i32
    %c0_i32_0 = arith.constant 0 : i32
    return %arg0, %c0_i32, %arg1 : i32, i32, i32
  }
  func.func @transform_4(%arg0: i32, %arg1: i32) -> (i32, i32, i32) {
    %c0_i32 = arith.constant 0 : i32
    %c0_i32_0 = arith.constant 0 : i32
    %c0_i32_1 = arith.constant 0 : i32
    return %arg0, %c0_i32, %c0_i32_0 : i32, i32, i32
  }
}

</mosaic_0001>

<bundles_post_ra>
// kernel: tpu_custom_call.1
= control target key start
LH: loop header
LB: loop body
LE: loop exit
PB: predicated region body
PF: predicated region fallthrough
CT: control target
= control target key end

     0   :  { %10 = vsyncpa [#allocation6], 0  ;;  %s1262_s0 = inlined_call_operand.hbm [shape: f32[2,4,256], index: 0, kind: input, shape index: {}]   ;;  %s1263_s1 = inlined_call_operand.hbm [shape: f32[2,4,256], index: 1, kind: input, shape index: {}]   ;;  %s1264_s2 = inlined_call_operand.vmem [shape: f32[4,1], index: 2, kind: input, shape index: {}]   ;;  %s1265_s3 = inlined_call_operand.hbm [shape: f32[2,1,256], index: 3, kind: output, shape index: {0}]   ;;  %s1266_s4 = inlined_call_operand.hbm [shape: f32[2,1,4], index: 4, kind: output, shape index: {1}]  }
   0x1   :  { %12 = vsyncpa [#allocation6 + $0x1], 0 }
   0x2   :  { %13 = vsyncpa [#allocation9], 0 }
   0x3   :  { %15 = vsyncpa [#allocation9 + $0x1], 0 }
   0x4   :  { %16 = vsyncpa [#allocation7], 0 }
   0x5   :  { %18 = vsyncpa [#allocation7 + $0x1], 0 }
   0x6   :  { %19 = vsyncpa [#allocation12], 0 }
   0x7   :  { %21 = vsyncpa [#allocation12 + $0x1], 0  ;;  %s997_s15 = smov 0   ;;  %s999_s16 = smov 0  }
   0x8   :  { %s1001_s17 = smov 0   ;;  %s1003_s18 = smov 0  }
   0x9   :  { %s1005_s19 = smov 0   ;;  %s1007_s20 = smov 0  }
   0xa LB: > { %s673_s21 = sadd.s32 4294967295, %s961_s20   ;;  %s674_s22 = sadd.s32 4294967294, %s961_s20   ;;  %s961_s20 = sphi %s1007_s20, %s27_s20   ;;  %s957_s19 = sphi %s1005_s19, %s1286_s19   ;;  %s953_s18 = sphi %s1003_s18, %s1285_s18   ;;  %s949_s17 = sphi %s1001_s17, %s1284_s17   ;;  %s945_s16 = sphi %s999_s16, %s1283_s16   ;;  %s941_s15 = sphi %s997_s15, %s1282_s15  }
   0xb   : > { %s39_s23 = sadd.s32 1, %s957_s19  ;;  %s48_s24 = sadd.s32 1, %s949_s17 }
   0xc   : > { %p41_p0 = scmp.ge.s32.totalorder %s39_s23, 2  ;;  %p55_p1 = scmp.ne.s32.totalorder %s949_s17, %s945_s16 }
   0xd   : > { %p56_p2 = scmp.eq.s32.totalorder %s961_s20, 0  ;;  %p61_p3 = scmp.ne.s32.totalorder %s945_s16, %s941_s15 }
   0xe   : > { %s1288_s23 = smov (%p41_p0, %s39_s23), 0  ;;  %p62_p5 = scmp.eq.s32.totalorder %s673_s21, 0 }
   0xf   : > { %p1038_p4 = por %p56_p2, %p55_p1  ;;  %s43_s26 = ssub.s32 %s957_s19, %s1288_s23 }
  0x10   : > { %p136_p6 = scmp.eq.s32.totalorder %s673_s21, 1  ;;  %p46_p7 = scmp.eq.s32.totalorder %s43_s26, 0 }
  0x11   : > { %p1044_p8 = por %p62_p5, %p61_p3  ;;  %p142_p10 = scmp.eq.s32.totalorder %s674_s22, 1 }
  0x12   : > { %p1048_p9 = por %p136_p6, %p55_p1  ;;  %p718_p13 = scmp.lt.s32.totalorder %s961_s20, 2 }
  0x13   : > { %s1270_s27 = scalar_select %p1044_p8, 1, 0 }
  0x14   : > { %s1271_s28 = scalar_select %p1048_p9, 1, 0 }
  0x15   : > { %s1053_s29 = scalar_select %p46_p7, %s949_s17, %s48_s24  }
  0x16   : > { %p1055_p11 = por %p142_p10, %p61_p3  ;;  %s1062_s5 = sand.u32 1, %s949_s17  }
  0x17   : > { %s677_s6 = sshll.u32 %s1062_s5, 3  ;;  %s693_s7 = sshll.u32 %s957_s19, 7 }
  0x18   : > { %s1272_s30 = scalar_select %p1055_p11, 1, 0 }
  0x19   : > { %s1071_s10 = scalar_lea.hbm %s1262_s0, %s693_s7  ;;  %s195_s11 = scalar_lea.vmem [#allocation5], %s677_s6 }
  0x1a   : > { %s205_s12 = sshll.u32 %s195_s11, 4  ;;  %p1079_p0 = pnand %p718_p13, %p1038_p4  ;;  %s1075_s12 = int_to_ptr.vmem [resolvable:$true] %s205_s12 }
  0x1b   : > { %s192_s14 = scalar_lea.sflag [#allocation6], %s1062_s5  ;;  %s783_s21 = scalar_lea.hbm %s1071_s10, 128 }
  0x1c   : > { %p784_p3 = scmp.ne.s32.totalorder %s1071_s10, %s783_s21  ;;  %p785_p5 = pneg %p1079_p0 }
  0x1d   : > { %s788_s25 = scalar_lea.hbm %s1262_s0, 256  ;;  %p789_p4 = scmp.lt.u32.totalorder %s1071_s10, %s1262_s0 }
  0x1e   : > { %p786_p6 = pnand %p785_p5, %p784_p3  ;;  %p790_p10 = scmp.lt.u32.totalorder %s788_s25, %s783_s21 }
  0x1f   : > { %p792_p12 = scmp.lt.u32.totalorder %s783_s21, %s1071_s10 }
  0x20   : > { %p787_p7 = pneg %p786_p6  ;;  %p791_p13 = por %p790_p10, %p789_p4 }
  0x22   : > { %p793_p1 = por %p792_p12, %p791_p13 }
  0x24   : > { %p794_p2 = pnand %p793_p1, %p787_p7 }
  0x26   : > { %797 = shalt.err (!%p794_p2)
}
  0x27   : > { %s798_s9 = scalar_lea.vmem %s1075_s12, 128  ;;  %s963_s11 = smov [#allocation5]  }
  0x28   : > { %p799_p3 = scmp.ne.s32.totalorder %s1075_s12, %s798_s9  ;;  %s803_s22 = sshll.u32 %s963_s11, 4  ;;  %s804_s22 = int_to_ptr.vmem [resolvable:$false] %s803_s22 }
  0x29   : > { %s805_s24 = scalar_lea.vmem %s804_s22, 256  ;;  %p806_p9 = scmp.lt.s32.totalorder %s1075_s12, %s804_s22 }
  0x2a   : > { %p801_p6 = pnand %p799_p3, %p785_p5  ;;  %p807_p4 = scmp.lt.s32.totalorder %s805_s24, %s798_s9 }
  0x2c   : > { %p802_p11 = pneg %p801_p6  ;;  %p808_p10 = por %p807_p4, %p806_p9 }
  0x2e   : > { %p809_p12 = pnand %p808_p10, %p802_p11 }
  0x30   : > { %812 = shalt.err (!%p809_p12)
}
  0x31   : > { %707 = dma.hbm_to_vmem [thread:$0]  (!%p1079_p0), %s1071_s10, 128, %s1075_s12, %s192_s14  }
  0x32   : > { %p1274_p1 = scmp.lt.s32.totalorder %s961_s20, 3  ;;  %p1275_p2 = scmp.ge.s32.totalorder %s961_s20, 1 }
  0x33   : > { %s1124_s8 = scalar_lea.hbm %s1263_s1, %s693_s7  ;;  %s216_s9 = scalar_lea.vmem [#allocation8], %s677_s6 }
  0x34   : > { %p1115_p7 = pnand %p1275_p2, %p1274_p1  ;;  %s226_s11 = sshll.u32 %s216_s9, 4  ;;  %s227_s11 = int_to_ptr.vmem [resolvable:$true] %s226_s11 }
  0x35   : > { %s213_s10 = scalar_lea.sflag [#allocation9], %s1062_s5  ;;  %s813_s12 = scalar_lea.hbm %s1124_s8, 128 }
  0x36   : > { %s1276_s21 = scalar_select %p1115_p7, 1, 0 }
  0x37   : > { %p814_p9 = scmp.ne.s32.totalorder %s1124_s8, %s813_s12  ;;  %s818_s7 = scalar_lea.hbm %s1263_s1, 256 }
  0x38   : > { %p819_p3 = scmp.lt.u32.totalorder %s1124_s8, %s1263_s1  ;;  %p820_p6 = scmp.lt.u32.totalorder %s818_s7, %s813_s12 }
  0x39   : > { %p816_p11 = pnand %p814_p9, %p785_p5  ;;  %p822_p10 = scmp.lt.u32.totalorder %s813_s12, %s1124_s8 }
  0x3a   : > { %p821_p4 = por %p820_p6, %p819_p3 }
  0x3b   : > { %p817_p13 = pneg %p816_p11 }
  0x3c   : > { %p823_p12 = por %p822_p10, %p821_p4 }
  0x3e   : > { %p824_p1 = pnand %p823_p12, %p817_p13 }
  0x40   : > { %827 = shalt.err (!%p824_p1)
}
  0x41   : > { %s828_s5 = scalar_lea.vmem %s227_s11, 128  ;;  %s964_s6 = smov [#allocation8]  }
  0x42   : > { %p829_p2 = scmp.ne.s32.totalorder %s227_s11, %s828_s5  ;;  %s833_s26 = sshll.u32 %s964_s6, 4  ;;  %s834_s26 = int_to_ptr.vmem [resolvable:$false] %s833_s26 }
  0x43   : > { %s835_s9 = scalar_lea.vmem %s834_s26, 256  ;;  %p836_p8 = scmp.lt.s32.totalorder %s227_s11, %s834_s26 }
  0x44   : > { %p831_p9 = pnand %p829_p2, %p785_p5  ;;  %p837_p7 = scmp.lt.s32.totalorder %s835_s9, %s828_s5 }
  0x46   : > { %p832_p11 = pneg %p831_p9  ;;  %p838_p3 = por %p837_p7, %p836_p8 }
  0x48   : > { %p839_p6 = pnand %p838_p3, %p832_p11 }
  0x4a   : > { %842 = shalt.err (!%p839_p6)
}
  0x4b   : > { %710 = dma.hbm_to_vmem [thread:$0]  (!%p1079_p0), %s1124_s8, 128, %s227_s11, %s213_s10  }
  0x4c   : > { %p1277_p13 = scmp.ne.s32.totalorder %s1276_s21, 0 }
  0x4d   : > { %s1151_s12 = sand.u32 (!%p1277_p13), 1, %s945_s16   ;;  %p1278_p5 = scmp.ne.s32.totalorder (!%p1277_p13), %s1270_s27, 0 }
  0x4e   : > { %235 = sbr.rel (%p1277_p13) target bundleno = 840 (0x348), region = 32  ;;  %s684_s14 = sshll.u32 (!%p1277_p13), %s1151_s12, 3 }
  0x4f   : > { %s238_s22 = scalar_lea.sflag (!%p1277_p13), [#allocation6], %s1151_s12  ;;  %s241_s7 = scalar_lea.vmem (!%p1277_p13), [#allocation5], %s684_s14 }
  0x55   : > { %924 = dma.done.wait (%p1278_p5), %s238_s22, 128  }
  0x56   : > { %926 = vsyncadd (%p1278_p5), %s238_s22, 4294967168  ;;  %s247_s13 = scalar_lea.sflag [#allocation9], %s1151_s12  ;;  %s250_s8 = scalar_lea.vmem [#allocation8], %s684_s14 }
  0x57   : > { %928 = dma.done.wait (%p1278_p5), %s247_s13, 128  }
  0x58   : > { %930 = vsyncadd (%p1278_p5), %s247_s13, 4294967168  ;;  %v965_v0 = vmov 0   ;;  %v299_v1 = vld [vmem:[%s1264_s2] sm:$0xf]  ;;  %vm291_vm0 = vcmask 0   ;;  %v307_v5 = vlaneseq  ;;  %vm316_vm1 = vcmask 1043456  }
  0x59   : > { %773 = vset.pattern.permute.xlu0 %v965_v0  ;;  %774 = vset.pattern.permute.xlu1 %v965_v0  ;;  %v966_v2 = vmov -1e+30   ;;  %v967_v3 = vmov 839922192   ;;  %v296_v8 = vld [vmem:[%s241_s7] sm:$0xff]  ;;  %v297_v9 = vld [vmem:[%s250_s8] sm:$0xff] }
  0x5a   : > { %302 = vperm.xlu0 %773, %v299_v1   ;;  %292 = vst.msk [vmem:[#allocation2] sm:$0x1] %vm291_vm0, %v966_v2  ;;  %v305_v4 = vunpack.c.l.s4 %v967_v3  ;;  %v308_v7 = vshrl.u32 %v307_v5, 7  ;;  %v298_v11 = vadd.f32 %v297_v9, %v296_v8  ;;  %v968_v21 = vmov 1966171168   ;;  %s686_s27 = sshll.u32 %s1151_s12, 1 }
  0x5b   : > { %v335_v22 = vunpack.c.l.s4 %v968_v21  ;;  %vm351_vm2 = vcmp.lt.s32.totalorder %v307_v5, 256  ;;  %s1169_s10 = scalar_lea.vmem [#allocation10], %s686_s27  ;;  %v969_v38 = vmov 0.0   ;;  %v397_v44 = vcombine.high %v296_v8, %v296_v8  ;;  %s695_s24 = sshll.u32 %s953_s18, 5 }
  0x5c   : > { %v306_v6 = vunpack.c.0.s8 %v305_v4  ;;  %293 = vst.msk [vmem:[#allocation3] sm:$0x1] %vm291_vm0, %v969_v38  ;;  %vm294_vm3 = vcmask 24576   ;;  %v1175_v46 = vsub.s32 0, %v308_v7  ;;  %s1183_s6 = scalar_lea.hbm %s1265_s3, %s695_s24  ;;  %s522_s26 = sshll.u32 %s1169_s10, 4  ;;  %s523_s26 = int_to_ptr.vmem [resolvable:$true] %s522_s26 }
  0x5d   : > { %v336_v27 = vunpack.c.0.s8 %v335_v22  ;;  %399 = vmatprep.subr.mxu0 %v397_v44  ;;  %295 = vst.msk [vmem:[#allocation4] sm:$0x1] %vm294_vm3, %v969_v38  ;;  %s502_s9 = scalar_lea.sflag [#allocation7], %s1151_s12  ;;  %s843_s14 = scalar_lea.vmem %s523_s26, 32 }
  0x5e   : > { %v309_v10 = vsub.s32 %v306_v6, %v308_v7  ;;  %400 = vmatpush1.xpose.msra.mxu0 %v296_v8  ;;  %p844_p8 = scmp.ne.s32.totalorder %s523_s26, %s843_s14  ;;  %p1279_p0 = scmp.ne.s32.totalorder %s1271_s28, 0 }
  0x5f   : > { %v339_v31 = vsub.s32 %v336_v27, %v308_v7  ;;  %s970_s22 = smov [#allocation10]  }
  0x60   : > { %p845_p7 = pnand %p844_p8, %p1279_p0  ;;  %s847_s7 = sshll.u32 %s970_s22, 4  ;;  %s848_s7 = int_to_ptr.vmem [resolvable:$false] %s847_s7 }
  0x61   : > { %v365_v39 = vld [vmem:[#allocation2] sm:$0x1]  ;;  %s849_s13 = scalar_lea.vmem %s848_s7, 64  ;;  %p850_p10 = scmp.lt.s32.totalorder %s523_s26, %s848_s7 }
  0x62   : > { %p846_p4 = pneg %p845_p7  ;;  %p851_p12 = scmp.lt.s32.totalorder %s849_s13, %s843_s14 }
  0x63   : > { %v388_v56 = vld [vmem:[#allocation3] sm:$0x1] }
  0x64   : > { %p852_p1 = por %p851_p12, %p850_p10 }
  0x66   : > { %p853_p2 = pnand %p852_p1, %p846_p4 }
  0xd9   : > { %v303_v12 = vpop.permute.xlu0 %302 }
  0xda   : > { %v310_v13 = vrot.slane %v303_v12, %v309_v10 }
  0xdc   : > { %v312_v14 = vmul.f32 %v310_v13, %v298_v11 }
  0xde   : > { %v314_v15 = vcombine.high %v312_v14, %v312_v14  ;;  %v317_v16 = vsel %vm316_vm1, %v312_v14, 0.0 }
  0xdf   : > { %v318_v17 = vrot.slane %v317_v16, 4 }
  0xe0   : > { %v324_v18 = vsel %vm316_vm1, %v314_v15, 0.0 }
  0xe1   : > { %v319_v19 = vadd.f32 %v318_v17, %v317_v16  ;;  %v325_v20 = vrot.slane %v324_v18, 4 }
  0xe3   : > { %v320_v23 = vrot.slane %v319_v19, 2  ;;  %v326_v24 = vadd.f32 %v325_v20, %v324_v18 }
  0xe5   : > { %v321_v25 = vadd.f32 %v320_v23, %v319_v19  ;;  %v327_v26 = vrot.slane %v326_v24, 2 }
  0xe7   : > { %v322_v28 = vrot.slane %v321_v25, 1  ;;  %v328_v29 = vadd.f32 %v327_v26, %v326_v24 }
  0xe9   : > { %v329_v30 = vrot.slane %v328_v29, 1  ;;  %v323_v32 = vadd.f32 %v322_v28, %v321_v25 }
  0xeb   : > { %v330_v33 = vadd.f32 %v329_v30, %v328_v29 }
  0xed   : > { %v366_v34 = vmax.f32 %v323_v32, %v330_v33  ;;  %v333_v35 = vcombine.low %v323_v32, %v330_v33 }
  0xef   : > { %367 = vmax.xlane.f32.xlu0 %v366_v34  ;;  %v340_v36 = vrot.slane %v333_v35, %v339_v31 }
  0xf1   : > { %v347_v37 = vrot.slane %v340_v36, %v339_v31 }
  0xf3   : > { %353 = vst.msk [vmem:[%s1169_s10] sm:$0x3] %vm351_vm2, %v347_v37 }
 0x17c   : > { %v368_v40 = vpop.xlane.xlu0 %367 }
 0x17d   : > { %v369_v41 = vmax.f32 %v365_v39, %v368_v40 }
 0x17f   : > { %v370_v42 = vsub.f32 %v365_v39, %v369_v41  ;;  %483 = vst.msk [vmem:[#allocation2] sm:$0x1] %vm291_vm0, %v369_v41  ;;  %375 = vperm.xlu1 %774, %v369_v41  }
 0x181   : > { %v371_v43 = vmul.f32 1.442695, %v370_v42 }
 0x183   : > { %775 = vpow2.f32 %v371_v43 }
 0x18d   : > { %v776_v45 = vpop.eup %775 }
 0x18e   : > { %472 = vperm.xlu0 %773, %v776_v45   ;;  %v389_v57 = vmul.f32 %v776_v45, %v388_v56 }
 0x1fe   : > { %v376_v47 = vpop.permute.xlu1 %375 }
 0x1ff   : > { %v381_v48 = vrot.slane %v376_v47, %v1175_v46 }
 0x201   : > { %v382_v49 = vsub.f32 %v323_v32, %v381_v48  ;;  %v383_v50 = vsub.f32 %v330_v33, %v381_v48 }
 0x203   : > { %v384_v51 = vmul.f32 1.442695, %v382_v49  ;;  %v386_v52 = vmul.f32 1.442695, %v383_v50 }
 0x205   : > { %777 = vpow2.f32 %v384_v51 }
 0x206   : > { %779 = vpow2.f32 %v386_v52 }
 0x20f   : > { %v778_v53 = vpop.eup %777 }
 0x210   : > { %v780_v54 = vpop.eup %779 }
 0x211   : > { %463 = vmatprep.mubr.f32.mxu0 %v780_v54  ;;  %v390_v55 = vadd.f32 %v780_v54, %v778_v53 }
 0x212   : > { %464 = vmatmul.mubr.f32.vlgmr.msra.gmra.mrb[0].mxu0 %v778_v53 }
 0x213   : > { %391 = vadd.xlane.f32.xlu1 %v390_v55 }
 0x2a0   : > { %v392_v58 = vpop.xlane.xlu1 %391 }
 0x2a1   : > { %v393_v59 = vadd.f32 %v392_v58, %v389_v57 }
 0x2a3   : > { %395 = vst.msk [vmem:[#allocation3] sm:$0x1] %vm291_vm0, %v393_v59 }
 0x2aa   : > { %v488_v60 = vld [vmem:[#allocation3] sm:$0x1] }
 0x2ab   : > { %781 = vrcp.f32 %v488_v60 }
 0x2b5   : > { %v782_v61 = vpop.eup %781 }
 0x2b6   : > { %492 = vperm.xlu1 %774, %v782_v61  }
 0x2b7   : > { %856 = shalt.err (!%p853_p2)
}
 0x2b8   : > { %s857_s8 = scalar_lea.hbm %s1183_s6, 32  ;;  %s861_s27 = scalar_lea.hbm %s1265_s3, 64 }
 0x2b9   : > { %p858_p9 = scmp.ne.s32.totalorder %s1183_s6, %s857_s8  ;;  %p862_p6 = scmp.lt.u32.totalorder %s1183_s6, %s1265_s3 }
 0x2ba   : > { %p863_p13 = scmp.lt.u32.totalorder %s861_s27, %s857_s8  ;;  %p865_p8 = scmp.lt.u32.totalorder %s857_s8, %s1183_s6 }
 0x2bb   : > { %p859_p11 = pnand %p858_p9, %p1279_p0 }
 0x2bc   : > { %p864_p5 = por %p863_p13, %p862_p6 }
 0x2bd   : > { %p860_p3 = pneg %p859_p11 }
 0x2be   : > { %p866_p7 = por %p865_p8, %p864_p5 }
 0x2c0   : > { %p867_p4 = pnand %p866_p7, %p860_p3 }
 0x2c2   : > { %870 = shalt.err (!%p867_p4)
}
 0x2c3   : > { %700 = dma.vmem_to_hbm [thread:$0]  (%p1279_p0), %s523_s26, 32, %s1183_s6, %s502_s9   ;;  %v473_v62 = vpop.permute.xlu0 %472  ;;  %v469_v0 = vld [vmem:[#allocation4] sm:$0x1] }
 0x2c4   : > { %v478_v63 = vrot.slane %v473_v62, %v1175_v46  ;;  %s690_s25 = sshll.u32 %s953_s18, 4  ;;  %s283_s5 = scalar_lea.vmem [#allocation11], %s1151_s12 }
 0x2c5   : > { %s535_s14 = sshll.u32 %s283_s5, 4  ;;  %s1212_s9 = scalar_lea.hbm %s1266_s4, %s690_s25  ;;  %s1214_s14 = int_to_ptr.vmem [resolvable:$true] %s535_s14 }
 0x2c6   : > { %v479_v1 = vmul.f32 %v478_v63, %v469_v0  ;;  %s507_s22 = scalar_lea.sflag [#allocation12], %s1151_s12  ;;  %s871_s18 = scalar_lea.vmem %s1214_s14, 16 }
 0x2c7   : > { %p872_p10 = scmp.ne.s32.totalorder %s1214_s14, %s871_s18  ;;  %s971_s7 = smov [#allocation11]  }
 0x2c8   : > { %s875_s13 = sshll.u32 %s971_s7, 4  ;;  %s876_s13 = int_to_ptr.vmem [resolvable:$false] %s875_s13 }
 0x2c9   : > { %p873_p12 = pnand %p872_p10, %p1279_p0  ;;  %s877_s8 = scalar_lea.vmem %s876_s13, 32 }
 0x2ca   : > { %p878_p2 = scmp.lt.s32.totalorder %s1214_s14, %s876_s13  ;;  %p879_p9 = scmp.lt.s32.totalorder %s877_s8, %s871_s18 }
 0x2cb   : > { %p874_p1 = pneg %p873_p12 }
 0x2cc   : > { %p880_p11 = por %p879_p9, %p878_p2 }
 0x2ce   : > { %p881_p3 = pnand %p880_p11, %p874_p1 }
 0x2e5   : > { %v465_v2 = vpop.f32.mrb[0].mxu0 }
 0x2e6   : > { %v480_v3 = vadd.f32 %v479_v1, %v465_v2  ;;  %v467_v4 = vpop.f32.mrb[1].mxu0 }
 0x2e8   : > { %482 = vst.msk [vmem:[#allocation4] sm:$0x1] %vm294_vm3, %v480_v3 }
 0x2ef   : > { %v487_v7 = vld [vmem:[#allocation4] sm:$0x1] }
 0x335   : > { %v493_v5 = vpop.permute.xlu1 %492 }
 0x336   : > { %v498_v6 = vrot.slane %v493_v5, %v1175_v46 }
 0x338   : > { %v499_v8 = vmul.f32 %v498_v6, %v487_v7 }
 0x33a   : > { %500 = vst.msk [vmem:[%s283_s5] sm:$0x1] %vm294_vm3, %v499_v8 }
 0x33b   : > { %884 = shalt.err (!%p881_p3)
}
 0x33c   : > { %s885_s12 = scalar_lea.hbm %s1212_s9, 16  ;;  %s889_s27 = scalar_lea.hbm %s1266_s4, 32 }
 0x33d   : > { %p886_p6 = scmp.ne.s32.totalorder %s1212_s9, %s885_s12  ;;  %p890_p8 = scmp.lt.u32.totalorder %s1212_s9, %s1266_s4 }
 0x33e   : > { %p891_p7 = scmp.lt.u32.totalorder %s889_s27, %s885_s12  ;;  %p893_p10 = scmp.lt.u32.totalorder %s885_s12, %s1212_s9 }
 0x33f   : > { %p887_p13 = pnand %p886_p6, %p1279_p0 }
 0x340   : > { %p892_p4 = por %p891_p7, %p890_p8 }
 0x341   : > { %p888_p5 = pneg %p887_p13 }
 0x342   : > { %p894_p12 = por %p893_p10, %p892_p4 }
 0x344   : > { %p895_p1 = pnand %p894_p12, %p888_p5 }
 0x346   : > { %898 = shalt.err (!%p895_p1)
}
 0x347   : > { %701 = dma.vmem_to_hbm [thread:$0]  (%p1279_p0), %s1214_s14, 16, %s1212_s9, %s507_s22  }
 0x348 PF: > { %s547_s25 = sand.u32 1, %s941_s15   ;;  %p1280_p2 = scmp.ne.s32.totalorder %s1272_s30, 0 }
 0x349   : > { %p1281_p9 = scmp.ge.s32.totalorder %s961_s20, 2  ;;  %s548_s5 = scalar_lea.sflag [#allocation7], %s547_s25 }
 0x34b   : > { %p712_p11 = pnand %p1281_p9, %p1280_p2 }
 0x34d   : > { %932 = dma.done.wait (!%p712_p11), %s548_s5, 32  }
 0x34e   : > { %934 = vsyncadd (!%p712_p11), %s548_s5, 4294967264  ;;  %s557_s6 = scalar_lea.sflag [#allocation12], %s547_s25 }
 0x34f   : > { %936 = dma.done.wait (!%p712_p11), %s557_s6, 16  }
 0x350   : > { %938 = vsyncadd (!%p712_p11), %s557_s6, 4294967280  ;;  %s27_s20 = sadd.s32 1, %s961_s20   ;;  %s1282_s15 = smov %s945_s16 }
 0x351   : > { %p24_p3 = scmp.ge.s32.totalorder %s27_s20, 4   ;;  %s1283_s16 = smov %s949_s17 }
 0x352   : > { %s1284_s17 = smov %s1053_s29  ;;  %s1285_s18 = smov %s957_s19 }
 0x353   : > { %s1286_s19 = smov %s1288_s23  ;;  %26 = sbr.rel (!%p24_p3) target bundleno = 10 (0xa), region = 115 }
 0x35a   :  { %561 = vsyncpa [#allocation6], 1 }
 0x35b   :  { %563 = vsyncpa [#allocation6 + $0x1], 1 }
 0x35c   :  { %564 = vsyncpa [#allocation9], 1 }
 0x35d   :  { %566 = vsyncpa [#allocation9 + $0x1], 1 }
 0x35e   :  { %567 = vsyncpa [#allocation7], 1 }
 0x35f   :  { %569 = vsyncpa [#allocation7 + $0x1], 1 }
 0x360   :  { %570 = vsyncpa [#allocation12], 1 }
 0x361   :  { %572 = vsyncpa [#allocation12 + $0x1], 1 }

</bundles_post_ra>
